<compile_context>
chip_gen: v5e
topology: v5e:2x2
jax: 0.10.0
libtpu: 0.0.40
codegen_flags: <defaults>
</compile_context>

<pallas_src>
import numpy as np
import jax
import jax.numpy as jnp
from jax.experimental import pallas as pl
from jax.experimental.pallas import tpu as pltpu


# ----------------------------------------------------------------------------
# PyTorch-style bilinear (align_corners=False) interpolation matrix
# ----------------------------------------------------------------------------
def _bilinear_matrix_np(in_size: int, out_size: int) -> np.ndarray:
    """(out_size, in_size) matrix reproducing F.interpolate bilinear weights."""
    if in_size == out_size:
        return np.eye(in_size, dtype=np.float32)
    scale = in_size / out_size
    dst = np.arange(out_size, dtype=np.float64)
    src = (dst + 0.5) * scale - 0.5
    src = np.maximum(src, 0.0)                       # PyTorch clamps at 0
    i0 = np.floor(src).astype(np.int64)
    i0 = np.minimum(i0, in_size - 1)
    i1 = np.minimum(i0 + 1, in_size - 1)
    frac = src - i0
    m = np.zeros((out_size, in_size), dtype=np.float64)
    rows = np.arange(out_size)
    np.add.at(m, (rows, i0), 1.0 - frac)
    np.add.at(m, (rows, i1), frac)
    return m.astype(np.float32)


def _round_up(x: int, m: int) -> int:
    return -(-x // m) * m


# ----------------------------------------------------------------------------
# Generation-aware block / VMEM planning
# ----------------------------------------------------------------------------
def _vmem_budget_bytes() -> int:
    try:
        cap = int(pltpu.get_tpu_info().vmem_capacity_bytes)
    except Exception:
        cap = 64 * 2**20                              # conservative (v7x-sized)
    # v7x (64 MiB)  -> ~44 MiB ; v5e/v6e (128 MiB) -> ~96 MiB
    return max(24 * 2**20, min(cap * 3 // 4, cap - 20 * 2**20))


def _plan_block(N, H, W, itemsize, resize_sizes):
    budget = _vmem_budget_bytes()

    def vmem_est(nb):
        # one streamed input block (VMEM-padded layout)
        blk_in = nb * _round_up(H, 16) * _round_up(W, 128) * itemsize
        d_f32 = nb * _round_up(H, 8) * _round_up(W, 128) * 4
        inter = 2 * d_f32                              # d, d*d / bf16 copy
        wbytes = 0
        for (hs, ws) in resize_sizes:
            wbytes += nb * _round_up(W, 16) * _round_up(ws, 128) * 2    # wwT_b
            wbytes += nb * _round_up(hs, 16) * _round_up(H, 128) * 2    # wh_b
            inter += nb * _round_up(H, 8) * _round_up(ws, 128) * 4      # r1
            inter += nb * _round_up(hs, 8) * _round_up(ws, 128) * 4     # r2
        # 2 streamed inputs x 2 pipeline buffers + weights (double-buffered)
        return 2 * 2 * blk_in + 2 * wbytes + inter + (4 * 2**20)

    target_bytes = 2 * 2**20                           # ~2 MiB HBM per input/step
    nb = max(1, min(N, target_bytes // max(1, H * W * itemsize)))
    while nb > 1 and vmem_est(nb) > budget:
        nb = max(1, nb * 3 // 4)
    est = vmem_est(nb)
    vmem_limit = int(min(budget, max(est * 3 // 2, 32 * 2**20)))
    return nb, vmem_limit


# ----------------------------------------------------------------------------
# Fused multi-scale SSE kernel (factory closes over the static scale layout)
# ----------------------------------------------------------------------------
def _make_fused_kernel(scale_kinds):
    n_resize = sum(1 for k in scale_kinds if k == "resize")

    def kernel(*args):
        # args = (p_ref, t_ref, resize weights..., o_ref)
        p_ref, t_ref = args[0], args[1]
        w_refs = args[2:2 + 2 * n_resize]
        o_ref = args[2 + 2 * n_resize]                 # VMEM (n_scales, 128) f32

        step = pl.program_id(0)

        @pl.when(step == 0)
        def _init():
            o_ref[...] = jnp.zeros_like(o_ref)

        # Cast inside the kernel (inputs stream from HBM in native dtype).
        d = p_ref[...].astype(jnp.float32) - t_ref[...].astype(jnp.float32)
        db = d.astype(jnp.bfloat16) if n_resize > 0 else None

        m = 0
        for i, kind in enumerate(scale_kinds):
            if kind == "native":
                sse = jnp.sum(d * d)                                   # f32, exact
            else:
                wwT_b = w_refs[2 * m][...]        # (nb, W, Ws)  bf16
                wh_b = w_refs[2 * m + 1][...]     # (nb, Hs, H)  bf16
                # W-resize then H-resize of the residual (resize is linear, so
                # resize(pred-target) == resize(pred)-resize(target)).
                r1 = jnp.einsum('nhw,nws->nhs', db, wwT_b,
                                preferred_element_type=jnp.float32)    # (nb,H,Ws)
                r2 = jnp.einsum('nah,nhs->nas', wh_b, r1.astype(jnp.bfloat16),
                                preferred_element_type=jnp.float32)    # (nb,Hs,Ws)
                sse = jnp.sum(r2 * r2)
                m += 1
            # Accumulate the per-step scalar into lane-dense output row i
            # (every lane of the row carries the same running SSE).
            o_ref[i, :] = o_ref[i, :] + sse

    return kernel


# ----------------------------------------------------------------------------
# MultiScaleLoss forward (base_loss_fn == MSE, mask == None)
# ----------------------------------------------------------------------------
def multi_scale_loss(pred, target,
                     scales=(1.0, 0.5, 0.25),
                     weights=(1.0, 0.5, 0.25)):
    if pred.shape != target.shape:
        raise ValueError(f"Shape mismatch: pred {pred.shape}, target {target.shape}")
    if len(scales) != len(weights):
        raise ValueError("Length of scales and weights must match")
    if not all(s > 0 for s in scales):
        raise ValueError("All scales must be positive")
    if not all(w >= 0 for w in weights):
        raise ValueError("All weights must be non-negative")

    B, C, H, W = pred.shape                    # layout: NCHW
    N = B * C
    itemsize = pred.dtype.itemsize

    scale_kinds, out_sizes, resize_sizes = [], [], []
    for s in scales:
        if s == 1.0:
            scale_kinds.append("native")
            out_sizes.append((H, W))
        else:
            hs, ws = int(H * s), int(W * s)
            scale_kinds.append("resize")
            out_sizes.append((hs, ws))
            resize_sizes.append((hs, ws))

    nb, vmem_limit = _plan_block(N, H, W, itemsize, resize_sizes)

    # Resize matrices in bf16, broadcast over the nb planes of a block so both
    # resize contractions are canonical batched matmuls (no kron, exact FLOPs).
    weight_inputs = []
    for (hs, ws) in resize_sizes:
        wh = _bilinear_matrix_np(H, hs)                                  # (Hs, H)
        ww = _bilinear_matrix_np(W, ws)                                  # (Ws, W)
        wwT_b = jnp.broadcast_to(jnp.asarray(ww.T, dtype=jnp.bfloat16), (nb, W, ws))
        wh_b = jnp.broadcast_to(jnp.asarray(wh, dtype=jnp.bfloat16), (nb, hs, H))
        weight_inputs += [wwT_b, wh_b]

    p = pred.reshape(N, H, W)
    t = target.reshape(N, H, W)
    n_groups = -(-N // nb)
    n_pad = n_groups * nb
    if n_pad != N:                             # zero planes contribute 0 to SSE
        padcfg = ((0, n_pad - N), (0, 0), (0, 0))
        p = jnp.pad(p, padcfg)
        t = jnp.pad(t, padcfg)

    n_scales = len(scales)
    in_specs = [pl.BlockSpec((nb, H, W), lambda n: (n, 0, 0)),
                pl.BlockSpec((nb, H, W), lambda n: (n, 0, 0))]
    for wmat in weight_inputs:                 # resident constants (constant map)
        in_specs.append(pl.BlockSpec(wmat.shape, lambda n: (0, 0, 0)))

    kernel = _make_fused_kernel(tuple(scale_kinds))

    out = pl.pallas_call(
        kernel,
        out_shape=jax.ShapeDtypeStruct((n_scales, 128), jnp.float32),
        grid_spec=pltpu.PrefetchScalarGridSpec(
            num_scalar_prefetch=0,
            grid=(n_groups,),
            in_specs=in_specs,
            out_specs=pl.BlockSpec((n_scales, 128), lambda n: (0, 0))),
        compiler_params=pltpu.CompilerParams(
            dimension_semantics=("arbitrary",),
            vmem_limit_bytes=vmem_limit),
    )(p, t, *weight_inputs)

    sse = out[:, 0]                            # per-scale sums of squared residuals
    total = jnp.float32(0.0)
    for j, (s, wgt) in enumerate(zip(scales, weights)):
        hs, ws = out_sizes[j]
        mse = sse[j] / jnp.float32(N * hs * ws)        # mean over true B*C*Hs*Ws
        total = total + jnp.float32(wgt) * mse
    return total


# ----------------------------------------------------------------------------
# Pure-JAX reference (resizes pred and target separately, like the PyTorch
# module, using the same interpolation matrices; full f32 precision).
# ----------------------------------------------------------------------------
def _reference(pred, target, scales, weights):
    B, C, H, W = pred.shape
    N = B * C
    p = pred.reshape(N, H, W).astype(jnp.float32)
    t = target.reshape(N, H, W).astype(jnp.float32)
    total = jnp.float32(0.0)
    for scale, weight in zip(scales, weights):
        if scale == 1.0:
            rp, rt = p, t
        else:
            hs, ws = int(H * scale), int(W * scale)
            wh = jnp.asarray(_bilinear_matrix_np(H, hs))
            ww = jnp.asarray(_bilinear_matrix_np(W, ws))
            rp = jnp.einsum('ah,nhw,bw->nab', wh, p, ww)
            rt = jnp.einsum('ah,nhw,bw->nab', wh, t, ww)
        total = total + jnp.float32(weight) * jnp.mean((rp - rt) ** 2)
    return total


if __name__ == "__main__":
    scales = (1.0, 0.5, 0.25)
    weights = (1.0, 0.5, 0.25)

    key = jax.random.PRNGKey(0)
    k1, k2 = jax.random.split(key)
    pred = jax.random.normal(k1, (2, 4, 16, 16), dtype=jnp.float32)
    target = jax.random.normal(k2, (2, 4, 16, 16), dtype=jnp.float32)

    # f32 input path (resize matmuls run in bf16 internally -> loosened rtol)
    loss = jax.block_until_ready(multi_scale_loss(pred, target, scales, weights))
    ref = jax.block_until_ready(_reference(pred, target, scales, weights))
    np.testing.assert_allclose(np.asarray(loss), np.asarray(ref),
                               rtol=1e-2, atol=1e-5)

    # bf16 input path (HBM streams bf16; kernel casts to f32 internally)
    pred_bf = pred.astype(jnp.bfloat16)
    target_bf = target.astype(jnp.bfloat16)
    loss_bf = jax.block_until_ready(multi_scale_loss(pred_bf, target_bf, scales, weights))
    ref_bf = jax.block_until_ready(_reference(pred_bf, target_bf, scales, weights))
    np.testing.assert_allclose(np.asarray(loss_bf), np.asarray(ref_bf),
                               rtol=2e-2, atol=1e-4)

    print("KERNEL_OK")
</pallas_src>

<mosaic_0001>
module attributes {stable_mosaic.version = 11 : i64} {
  func.func @kernel(%arg0: i32, %arg1: memref<8x16x16xf32, #tpu.memory_space<vmem>>, %arg2: memref<8x16x16xf32, #tpu.memory_space<vmem>>, %arg3: memref<8x16x8xbf16, #tpu.memory_space<vmem>>, %arg4: memref<8x8x16xbf16, #tpu.memory_space<vmem>>, %arg5: memref<8x16x4xbf16, #tpu.memory_space<vmem>>, %arg6: memref<8x4x16xbf16, #tpu.memory_space<vmem>>, %arg7: memref<3x128xf32, #tpu.memory_space<vmem>>) attributes {dimension_semantics = [#tpu.dimension_semantics<arbitrary>], iteration_bounds = array<i64: 1>, scalar_prefetch = 0 : i64, scratch_operands = 0 : i64, tpu.core_type = #tpu.core_type<tc>, window_params = [{transform_indices = @transform_0, window_bounds = array<i64: 8, 16, 16>}, {transform_indices = @transform_1, window_bounds = array<i64: 8, 16, 16>}, {pipeline_mode = #tpu.pipeline_mode<synchronous>, transform_indices = @transform_2, window_bounds = array<i64: 8, 16, 8>}, {pipeline_mode = #tpu.pipeline_mode<synchronous>, transform_indices = @transform_3, window_bounds = array<i64: 8, 8, 16>}, {pipeline_mode = #tpu.pipeline_mode<synchronous>, transform_indices = @transform_4, window_bounds = array<i64: 8, 16, 4>}, {pipeline_mode = #tpu.pipeline_mode<synchronous>, transform_indices = @transform_5, window_bounds = array<i64: 8, 4, 16>}, {pipeline_mode = #tpu.pipeline_mode<synchronous>, transform_indices = @transform_6, window_bounds = array<i64: 3, 128>}]} {
    %c0_i32 = arith.constant 0 : i32
    %0 = arith.cmpi eq, %arg0, %c0_i32 : i32
    %1 = arith.extui %0 : i1 to i32
    %c0_i32_0 = arith.constant 0 : i32
    %2 = arith.cmpi ne, %1, %c0_i32_0 : i32
    scf.if %2 {
      %cst_34 = arith.constant 0.000000e+00 : f32
      %53 = vector.broadcast %cst_34 : f32 to vector<3x128xf32>
      %c0_35 = arith.constant 0 : index
      %c0_36 = arith.constant 0 : index
      %54 = vector.load %arg7[%c0_35, %c0_36] : memref<3x128xf32, #tpu.memory_space<vmem>>, vector<3x128xf32>
      tpu.vector_store %arg7[%c0_35, %c0_36], %53 {strides = array<i32>} : memref<3x128xf32, #tpu.memory_space<vmem>>, vector<3x128xf32>,
    } else {
    }
    %c0 = arith.constant 0 : index
    %c0_1 = arith.constant 0 : index
    %c0_2 = arith.constant 0 : index
    %3 = vector.load %arg1[%c0, %c0_1, %c0_2] : memref<8x16x16xf32, #tpu.memory_space<vmem>>, vector<8x16x16xf32>
    %c0_3 = arith.constant 0 : index
    %c0_4 = arith.constant 0 : index
    %c0_5 = arith.constant 0 : index
    %4 = vector.load %arg2[%c0_3, %c0_4, %c0_5] : memref<8x16x16xf32, #tpu.memory_space<vmem>>, vector<8x16x16xf32>
    %5 = arith.subf %3, %4 : vector<8x16x16xf32>
    %6 = arith.truncf %5 : vector<8x16x16xf32> to vector<8x16x16xbf16>
    %7 = arith.mulf %5, %5 : vector<8x16x16xf32>
    %8 = vector.shape_cast %7 : vector<8x16x16xf32> to vector<1x8x16x16xf32>
    %cst = arith.constant dense<0.000000e+00> : vector<1xf32>
    %9 = vector.multi_reduction <add>, %8, %cst [1, 2, 3] : vector<1x8x16x16xf32> to vector<1xf32>
    %10 = vector.shape_cast %9 : vector<1xf32> to vector<1x1x1x1xf32>
    %11 = vector.extract %10[0, 0, 0, 0] : f32 from vector<1x1x1x1xf32>
    %c0_6 = arith.constant 0 : index
    %c0_7 = arith.constant 0 : index
    %12 = vector.load %arg7[%c0_6, %c0_7] : memref<3x128xf32, #tpu.memory_space<vmem>>, vector<1x128xf32>
    %13 = vector.shape_cast %12 : vector<1x128xf32> to vector<128xf32>
    %14 = vector.broadcast %11 : f32 to vector<128xf32>
    %15 = arith.addf %13, %14 : vector<128xf32>
    %c0_8 = arith.constant 0 : index
    %c0_9 = arith.constant 0 : index
    %16 = vector.load %arg7[%c0_8, %c0_9] : memref<3x128xf32, #tpu.memory_space<vmem>>, vector<1x128xf32>
    %17 = vector.shape_cast %16 : vector<1x128xf32> to vector<128xf32>
    %18 = vector.shape_cast %15 : vector<128xf32> to vector<1x128xf32>
    tpu.vector_store %arg7[%c0_8, %c0_9], %18 {strides = array<i32>} : memref<3x128xf32, #tpu.memory_space<vmem>>, vector<1x128xf32>,
    %c0_10 = arith.constant 0 : index
    %c0_11 = arith.constant 0 : index
    %c0_12 = arith.constant 0 : index
    %19 = vector.load %arg3[%c0_10, %c0_11, %c0_12] : memref<8x16x8xbf16, #tpu.memory_space<vmem>>, vector<8x16x8xbf16>
    %c0_13 = arith.constant 0 : index
    %c0_14 = arith.constant 0 : index
    %c0_15 = arith.constant 0 : index
    %20 = vector.load %arg4[%c0_13, %c0_14, %c0_15] : memref<8x8x16xbf16, #tpu.memory_space<vmem>>, vector<8x8x16xbf16>
    "tpu.trace_start"() <{level = 10 : i32, message = "nhw,nws->nhs"}> : () -> ()
    %cst_16 = arith.constant dense<0.000000e+00> : vector<8x16x8xf32>
    %21 = tpu.matmul %6, %19, %cst_16 {dimension_numbers = #tpu.dot_dimension_numbers<[2], [1], [1], [2], [0, 0, 0, 1, 1, 2], [0], [0]>} : vector<8x16x16xbf16>, vector<8x16x8xbf16>, vector<8x16x8xf32> -> vector<8x16x8xf32>
    "tpu.trace_stop"() : () -> ()
    %22 = arith.truncf %21 : vector<8x16x8xf32> to vector<8x16x8xbf16>
    "tpu.trace_start"() <{level = 10 : i32, message = "nah,nhs->nas"}> : () -> ()
    %cst_17 = arith.constant dense<0.000000e+00> : vector<8x8x8xf32>
    %23 = tpu.matmul %20, %22, %cst_17 {dimension_numbers = #tpu.dot_dimension_numbers<[2], [1], [1], [2], [0, 0, 0, 1, 1, 2], [0], [0]>} : vector<8x8x16xbf16>, vector<8x16x8xbf16>, vector<8x8x8xf32> -> vector<8x8x8xf32>
    "tpu.trace_stop"() : () -> ()
    %24 = arith.mulf %23, %23 : vector<8x8x8xf32>
    %25 = vector.shape_cast %24 : vector<8x8x8xf32> to vector<1x8x8x8xf32>
    %cst_18 = arith.constant dense<0.000000e+00> : vector<1xf32>
    %26 = vector.multi_reduction <add>, %25, %cst_18 [1, 2, 3] : vector<1x8x8x8xf32> to vector<1xf32>
    %27 = vector.shape_cast %26 : vector<1xf32> to vector<1x1x1x1xf32>
    %28 = vector.extract %27[0, 0, 0, 0] : f32 from vector<1x1x1x1xf32>
    %c1 = arith.constant 1 : index
    %c0_19 = arith.constant 0 : index
    %29 = vector.load %arg7[%c1, %c0_19] : memref<3x128xf32, #tpu.memory_space<vmem>>, vector<1x128xf32>
    %30 = vector.shape_cast %29 : vector<1x128xf32> to vector<128xf32>
    %31 = vector.broadcast %28 : f32 to vector<128xf32>
    %32 = arith.addf %30, %31 : vector<128xf32>
    %c1_20 = arith.constant 1 : index
    %c0_21 = arith.constant 0 : index
    %33 = vector.load %arg7[%c1_20, %c0_21] : memref<3x128xf32, #tpu.memory_space<vmem>>, vector<1x128xf32>
    %34 = vector.shape_cast %33 : vector<1x128xf32> to vector<128xf32>
    %35 = vector.shape_cast %32 : vector<128xf32> to vector<1x128xf32>
    tpu.vector_store %arg7[%c1_20, %c0_21], %35 {strides = array<i32>} : memref<3x128xf32, #tpu.memory_space<vmem>>, vector<1x128xf32>,
    %c0_22 = arith.constant 0 : index
    %c0_23 = arith.constant 0 : index
    %c0_24 = arith.constant 0 : index
    %36 = vector.load %arg5[%c0_22, %c0_23, %c0_24] : memref<8x16x4xbf16, #tpu.memory_space<vmem>>, vector<8x16x4xbf16>
    %c0_25 = arith.constant 0 : index
    %c0_26 = arith.constant 0 : index
    %c0_27 = arith.constant 0 : index
    %37 = vector.load %arg6[%c0_25, %c0_26, %c0_27] : memref<8x4x16xbf16, #tpu.memory_space<vmem>>, vector<8x4x16xbf16>
    "tpu.trace_start"() <{level = 10 : i32, message = "nhw,nws->nhs"}> : () -> ()
    %cst_28 = arith.constant dense<0.000000e+00> : vector<8x16x4xf32>
    %38 = tpu.matmul %6, %36, %cst_28 {dimension_numbers = #tpu.dot_dimension_numbers<[2], [1], [1], [2], [0, 0, 0, 1, 1, 2], [0], [0]>} : vector<8x16x16xbf16>, vector<8x16x4xbf16>, vector<8x16x4xf32> -> vector<8x16x4xf32>
    "tpu.trace_stop"() : () -> ()
    %39 = arith.truncf %38 : vector<8x16x4xf32> to vector<8x16x4xbf16>
    "tpu.trace_start"() <{level = 10 : i32, message = "nah,nhs->nas"}> : () -> ()
    %cst_29 = arith.constant dense<0.000000e+00> : vector<8x4x4xf32>
    %40 = tpu.matmul %37, %39, %cst_29 {dimension_numbers = #tpu.dot_dimension_numbers<[2], [1], [1], [2], [0, 0, 0, 1, 1, 2], [0], [0]>} : vector<8x4x16xbf16>, vector<8x16x4xbf16>, vector<8x4x4xf32> -> vector<8x4x4xf32>
    "tpu.trace_stop"() : () -> ()
    %41 = arith.mulf %40, %40 : vector<8x4x4xf32>
    %42 = vector.shape_cast %41 : vector<8x4x4xf32> to vector<1x8x4x4xf32>
    %cst_30 = arith.constant dense<0.000000e+00> : vector<1xf32>
    %43 = vector.multi_reduction <add>, %42, %cst_30 [1, 2, 3] : vector<1x8x4x4xf32> to vector<1xf32>
    %44 = vector.shape_cast %43 : vector<1xf32> to vector<1x1x1x1xf32>
    %45 = vector.extract %44[0, 0, 0, 0] : f32 from vector<1x1x1x1xf32>
    %c2 = arith.constant 2 : index
    %c0_31 = arith.constant 0 : index
    %46 = vector.load %arg7[%c2, %c0_31] : memref<3x128xf32, #tpu.memory_space<vmem>>, vector<1x128xf32>
    %47 = vector.shape_cast %46 : vector<1x128xf32> to vector<128xf32>
    %48 = vector.broadcast %45 : f32 to vector<128xf32>
    %49 = arith.addf %47, %48 : vector<128xf32>
    %c2_32 = arith.constant 2 : index
    %c0_33 = arith.constant 0 : index
    %50 = vector.load %arg7[%c2_32, %c0_33] : memref<3x128xf32, #tpu.memory_space<vmem>>, vector<1x128xf32>
    %51 = vector.shape_cast %50 : vector<1x128xf32> to vector<128xf32>
    %52 = vector.shape_cast %49 : vector<128xf32> to vector<1x128xf32>
    tpu.vector_store %arg7[%c2_32, %c0_33], %52 {strides = array<i32>} : memref<3x128xf32, #tpu.memory_space<vmem>>, vector<1x128xf32>,
    return
  }
  func.func @transform_0(%arg0: i32) -> (i32, i32, i32) {
    %c0_i32 = arith.constant 0 : i32
    %c0_i32_0 = arith.constant 0 : i32
    %c0_i32_1 = arith.constant 0 : i32
    return %arg0, %c0_i32, %c0_i32_0 : i32, i32, i32
  }
  func.func @transform_1(%arg0: i32) -> (i32, i32, i32) {
    %c0_i32 = arith.constant 0 : i32
    %c0_i32_0 = arith.constant 0 : i32
    %c0_i32_1 = arith.constant 0 : i32
    return %arg0, %c0_i32, %c0_i32_0 : i32, i32, i32
  }
  func.func @transform_2(%arg0: i32) -> (i32, i32, i32) {
    %c0_i32 = arith.constant 0 : i32
    %c0_i32_0 = arith.constant 0 : i32
    %c0_i32_1 = arith.constant 0 : i32
    %c0_i32_2 = arith.constant 0 : i32
    return %c0_i32, %c0_i32_0, %c0_i32_1 : i32, i32, i32
  }
  func.func @transform_3(%arg0: i32) -> (i32, i32, i32) {
    %c0_i32 = arith.constant 0 : i32
    %c0_i32_0 = arith.constant 0 : i32
    %c0_i32_1 = arith.constant 0 : i32
    %c0_i32_2 = arith.constant 0 : i32
    return %c0_i32, %c0_i32_0, %c0_i32_1 : i32, i32, i32
  }
  func.func @transform_4(%arg0: i32) -> (i32, i32, i32) {
    %c0_i32 = arith.constant 0 : i32
    %c0_i32_0 = arith.constant 0 : i32
    %c0_i32_1 = arith.constant 0 : i32
    %c0_i32_2 = arith.constant 0 : i32
    return %c0_i32, %c0_i32_0, %c0_i32_1 : i32, i32, i32
  }
  func.func @transform_5(%arg0: i32) -> (i32, i32, i32) {
    %c0_i32 = arith.constant 0 : i32
    %c0_i32_0 = arith.constant 0 : i32
    %c0_i32_1 = arith.constant 0 : i32
    %c0_i32_2 = arith.constant 0 : i32
    return %c0_i32, %c0_i32_0, %c0_i32_1 : i32, i32, i32
  }
  func.func @transform_6(%arg0: i32) -> (i32, i32) {
    %c0_i32 = arith.constant 0 : i32
    %c0_i32_0 = arith.constant 0 : i32
    %c0_i32_1 = arith.constant 0 : i32
    return %c0_i32, %c0_i32_0 : i32, i32
  }
}

</mosaic_0001>

<bundles_post_ra>
// kernel: tpu_custom_call.1
= control target key start
LH: loop header
LB: loop body
LE: loop exit
PB: predicated region body
PF: predicated region fallthrough
CT: control target
= control target key end

     0   :  { %11 = vsyncpa [#allocation3], 0  ;;  %s1630_s0 = inlined_call_operand.vmem [shape: f32[8,16,16], index: 0, kind: input, shape index: {}]   ;;  %s1631_s1 = inlined_call_operand.hbm [shape: f32[8,16,16], index: 1, kind: input, shape index: {}]   ;;  %s1632_s2 = inlined_call_operand.vmem [shape: bf16[8,16,8], index: 2, kind: input, shape index: {}]   ;;  %s1633_s3 = inlined_call_operand.vmem [shape: bf16[8,8,16], index: 3, kind: input, shape index: {}]   ;;  %s1634_s4 = inlined_call_operand.vmem [shape: bf16[8,16,4], index: 4, kind: input, shape index: {}]   ;;  %s1635_s5 = inlined_call_operand.hbm [shape: bf16[8,4,16], index: 5, kind: input, shape index: {}]   ;;  %s1636_s6 = inlined_call_operand.hbm [shape: f32[3,128], index: 6, kind: output, shape index: {}]  }
   0x1   :  { %12 = vsyncpa [#allocation6], 0 }
   0x2   :  { %13 = vsyncpa [#allocation4], 0  ;;  %s20_s23 = sshll.u32 %s1631_s1, 4  ;;  %s1299_s24 = smov [#allocation2]   ;;  %s21_s23 = int_to_ptr.hbm [resolvable:$true] %s20_s23 }
   0x3   :  { %s22_s25 = sshll.u32 %s1299_s24, 4  ;;  %s39_s28 = sshll.u32 %s1635_s5, 4  ;;  %s23_s25 = int_to_ptr.vmem [resolvable:$true] %s22_s25  ;;  %s40_s28 = int_to_ptr.hbm [resolvable:$true] %s39_s28 }
   0x4   :  { %s1300_s29 = smov 128   ;;  %s1301_s30 = smov 8  }
   0x5   :  { %28 = dma.hbm_to_vmem [thread:$0]  %s21_s23, 2048, %s23_s25, [#allocation3], %s1300_s29, %s1300_s29, %s1301_s30  }
   0x6   :  { %s1302_s7 = smov [#allocation5]   ;;  %s1303_s9 = smov 32  }
   0x7   :  { %s41_s8 = sshll.u32 %s1302_s7, 4  ;;  %s1304_s10 = smov 2   ;;  %s42_s8 = int_to_ptr.vmem [resolvable:$true] %s41_s8 }
   0x8   :  { %47 = dma.hbm_to_vmem [thread:$0]  %s40_s28, 256, %s42_s8, [#allocation6], %s1303_s9, %s1303_s9, %s1304_s10  }
   0x9   :  { %1293 = dma.done.wait [#allocation3], 2048  }
   0xa   :  { %1294 = vsyncadd [#allocation3], 4294965248 }
   0xb   :  { %1295 = dma.done.wait [#allocation6], 256  }
   0xc   :  { %1296 = vsyncadd [#allocation6], 4294967040  ;;  %v1191_v0 = vld [vmem:[%s1632_s2] sm:$0xff]  ;;  %v1193_v1 = vld [vmem:[%s1632_s2 + $0x10] sm:$0xff]  ;;  %vm142_vm0 = vcmask 130048   ;;  %vm635_vm1 = vcmask 64512  }
   0xd   :  { %v1194_v2 = vld [vmem:[%s1632_s2 + $0x18] sm:$0xff]  ;;  %v1192_v3 = vld [vmem:[%s1632_s2 + $0x8] sm:$0xff]  ;;  %v62_v4 = vld [vmem:[%s1630_s0] sm:$0xff]  ;;  %232 = vmatpush.bf16.msra.mxu0 %v1191_v0  ;;  %288 = vmatpush.bf16.msra.mxu2 %v1193_v1  ;;  %vm1048_vm2 = vcmask 27648   ;;  %s1306_s9 = smov [#allocation7]   ;;  %s1084_s12 = sshll.u32 %s1636_s6, 4  ;;  %s1085_s12 = int_to_ptr.hbm [resolvable:$true] %s1084_s12 }
   0xe   :  { %v63_v5 = vld [vmem:[%s1630_s0 + $0x8] sm:$0xff]  ;;  %v78_v6 = vld [vmem:[#allocation2] sm:$0xff]  ;;  %316 = vmatpush.bf16.msra.mxu3 %v1194_v2  ;;  %260 = vmatpush.bf16.msra.mxu1 %v1192_v3  ;;  %v68_v16 = vld [vmem:[%s1630_s0 + $0x30] sm:$0xff]  ;;  %s1082_s10 = sshll.u32 %s1306_s9, 4  ;;  %s1083_s10 = int_to_ptr.vmem [resolvable:$true] %s1082_s10 }
   0xf   :  { %v79_v7 = vld [vmem:[#allocation2 + $0x8] sm:$0xff]  ;;  %v66_v8 = vld [vmem:[%s1630_s0 + $0x20] sm:$0xff]  ;;  %v94_v9 = vsub.f32 %v62_v4, %v78_v6  ;;  %v69_v17 = vld [vmem:[%s1630_s0 + $0x38] sm:$0xff] }
  0x10   :  { %v95_v10 = vsub.f32 %v63_v5, %v79_v7  ;;  %v67_v11 = vld [vmem:[%s1630_s0 + $0x28] sm:$0xff]  ;;  %v82_v12 = vld [vmem:[#allocation2 + $0x20] sm:$0xff]  ;;  %v84_v18 = vld [vmem:[#allocation2 + $0x30] sm:$0xff] }
  0x11   :  { %v83_v13 = vld [vmem:[#allocation2 + $0x28] sm:$0xff]  ;;  %v98_v14 = vsub.f32 %v66_v8, %v82_v12  ;;  %v110_v19 = vpack.c.bf16 %v94_v9, %v94_v9  ;;  %v126_v21 = vmul.f32 %v94_v9, %v94_v9  ;;  %v85_v23 = vld [vmem:[#allocation2 + $0x38] sm:$0xff]  ;;  %v64_v24 = vld [vmem:[%s1630_s0 + $0x10] sm:$0xff]  ;;  %v1403_v44 = vsub.f32 %v68_v16, %v84_v18 }
  0x12   :  { %v99_v15 = vsub.f32 %v67_v11, %v83_v13  ;;  %v111_v20 = vpack.c.bf16 %v95_v10, %v95_v10  ;;  %v127_v22 = vmul.f32 %v95_v10, %v95_v10  ;;  %v65_v25 = vld [vmem:[%s1630_s0 + $0x18] sm:$0xff]  ;;  %v80_v28 = vld [vmem:[#allocation2 + $0x10] sm:$0xff]  ;;  %v1195_v30 = vld [vmem:[%s1632_s2 + $0x20] sm:$0xff]  ;;  %v1405_v45 = vsub.f32 %v69_v17, %v85_v23 }
  0x13   :  { %v114_v26 = vpack.c.bf16 %v98_v14, %v98_v14  ;;  %v81_v29 = vld [vmem:[#allocation2 + $0x18] sm:$0xff]  ;;  %v143_v31 = vsel %vm142_vm0, %v126_v21, 0.0  ;;  %v213_v33 = vunpack.c.l.b16 %v110_v19  ;;  %v1197_v35 = vld [vmem:[%s1632_s2 + $0x30] sm:$0xff]  ;;  %v1196_v37 = vld [vmem:[%s1632_s2 + $0x28] sm:$0xff]  ;;  %344 = vmatpush.bf16.msrb.mxu0 %v1195_v30  ;;  %v130_v48 = vmul.f32 %v98_v14, %v98_v14 }
  0x14   :  { %v115_v27 = vpack.c.bf16 %v99_v15, %v99_v15  ;;  %v144_v32 = vsel %vm142_vm0, %v127_v22, 0.0  ;;  %v214_v34 = vunpack.c.l.b16 %v111_v20  ;;  %v1198_v36 = vld [vmem:[%s1632_s2 + $0x38] sm:$0xff]  ;;  %v70_v40 = vld [vmem:[%s1630_s0 + $0x40] sm:$0xff]  ;;  %400 = vmatpush.bf16.msrb.mxu2 %v1197_v35  ;;  %v71_v46 = vld [vmem:[%s1630_s0 + $0x48] sm:$0xff]  ;;  %v131_v49 = vmul.f32 %v99_v15, %v99_v15  ;;  %372 = vmatpush.bf16.msrb.mxu1 %v1196_v37 }
  0x15   :  { %v145_v38 = vadd.f32 %v144_v32, %v143_v31  ;;  %v269_v39 = vunpack.c.l.b16 %v114_v26  ;;  %v86_v41 = vld [vmem:[#allocation2 + $0x40] sm:$0xff]  ;;  %428 = vmatpush.bf16.msrb.mxu3 %v1198_v36  ;;  %v87_v47 = vld [vmem:[#allocation2 + $0x48] sm:$0xff]  ;;  %v96_v50 = vsub.f32 %v64_v24, %v80_v28  ;;  %v97_v51 = vsub.f32 %v65_v25, %v81_v29  ;;  %v76_v6 = vld [vmem:[%s1630_s0 + $0x70] sm:$0xff] }
  0x16   :  { %v1401_v42 = vpack.c.b16 %v214_v34, %v213_v33  ;;  %v270_v43 = vunpack.c.l.b16 %v115_v27  ;;  %v116_v53 = vpack.c.bf16 %v1403_v44, %v1403_v44  ;;  %v117_v54 = vpack.c.bf16 %v1405_v45, %v1405_v45  ;;  %v74_v60 = vld [vmem:[%s1630_s0 + $0x60] sm:$0xff]  ;;  %v75_v0 = vld [vmem:[%s1630_s0 + $0x68] sm:$0xff]  ;;  %v77_v7 = vld [vmem:[%s1630_s0 + $0x78] sm:$0xff] }
  0x17   :  { %v1418_v55 = vsub.f32 %v70_v40, %v86_v41  ;;  %v112_v56 = vpack.c.bf16 %v96_v50, %v96_v50  ;;  %v113_v57 = vpack.c.bf16 %v97_v51, %v97_v51  ;;  %v128_v58 = vmul.f32 %v96_v50, %v96_v50  ;;  %v90_v1 = vld [vmem:[#allocation2 + $0x60] sm:$0xff]  ;;  %v91_v2 = vld [vmem:[#allocation2 + $0x68] sm:$0xff]  ;;  %v92_v8 = vld [vmem:[#allocation2 + $0x70] sm:$0xff] }
  0x18   :  { %1099 = vmatmul.msk.bf16.vlgmr.msra.gmra.mxu0 %vm142_vm0, %v1401_v42  ;;  %v1412_v52 = vpack.c.b16 %v270_v43, %v269_v39  ;;  %v1420_v59 = vsub.f32 %v71_v46, %v87_v47  ;;  %v297_v61 = vunpack.c.l.b16 %v116_v53  ;;  %v298_v62 = vunpack.c.l.b16 %v117_v54  ;;  %v93_v13 = vld [vmem:[#allocation2 + $0x78] sm:$0xff]  ;;  %v72_v14 = vld [vmem:[%s1630_s0 + $0x50] sm:$0xff] }
  0x19   :  { %v129_v63 = vmul.f32 %v97_v51, %v97_v51  ;;  %v146_v3 = vsel %vm142_vm0, %v128_v58, 0.0  ;;  %v241_v4 = vunpack.c.l.b16 %v112_v56  ;;  %v242_v5 = vunpack.c.l.b16 %v113_v57  ;;  %v88_v15 = vld [vmem:[#allocation2 + $0x50] sm:$0xff]  ;;  %v73_v20 = vld [vmem:[%s1630_s0 + $0x58] sm:$0xff] }
  0x1a   :  { %1109 = vmatmul.msk.bf16.vlgmr.msra.gmra.mxu2 %vm142_vm0, %v1412_v52  ;;  %v1437_v9 = vpack.c.b16 %v298_v62, %v297_v61  ;;  %v147_v10 = vadd.f32 %v146_v3, %v145_v38  ;;  %v118_v12 = vpack.c.bf16 %v1418_v55, %v1418_v55  ;;  %v150_v16 = vsel %vm142_vm0, %v130_v48, 0.0  ;;  %v89_v21 = vld [vmem:[#allocation2 + $0x58] sm:$0xff] }
  0x1b   :  { %v148_v11 = vsel %vm142_vm0, %v129_v63, 0.0  ;;  %v152_v17 = vsel %vm142_vm0, %v131_v49, 0.0  ;;  %v1447_v18 = vpack.c.b16 %v242_v5, %v241_v4  ;;  %v119_v19 = vpack.c.bf16 %v1420_v59, %v1420_v59  ;;  %v203_v4 = vld [vmem:[%s1633_s3] sm:$0xf] }
  0x1c   :  { %1114 = vmatmul.msk.bf16.vlgmr.msra.gmra.mxu3 %vm142_vm0, %v1437_v9  ;;  %v149_v22 = vadd.f32 %v148_v11, %v147_v10  ;;  %v325_v23 = vunpack.c.l.b16 %v118_v12  ;;  %v1456_v24 = vsub.f32 %v74_v60, %v90_v1  ;;  %v1458_v25 = vsub.f32 %v75_v0, %v91_v2 }
  0x1d   :  { %1104 = vmatmul.msk.bf16.vlgmr.msra.gmra.mxu1 %vm142_vm0, %v1447_v18  ;;  %v326_v26 = vunpack.c.l.b16 %v119_v19  ;;  %v1462_v27 = vsub.f32 %v76_v6, %v92_v8  ;;  %v1464_v28 = vsub.f32 %v77_v7, %v93_v13  ;;  %v1466_v29 = vsub.f32 %v72_v14, %v88_v15 }
  0x1e   :  { %v151_v30 = vadd.f32 %v150_v16, %v149_v22  ;;  %v122_v31 = vpack.c.bf16 %v1456_v24, %v1456_v24  ;;  %v123_v32 = vpack.c.bf16 %v1458_v25, %v1458_v25  ;;  %v1472_v33 = vsub.f32 %v73_v20, %v89_v21  ;;  %v204_v21 = vld [vmem:[%s1633_s3 + $0x4] sm:$0xf] }
  0x1f   :  { %v124_v34 = vpack.c.bf16 %v1462_v27, %v1462_v27  ;;  %v125_v38 = vpack.c.bf16 %v1464_v28, %v1464_v28  ;;  %v120_v39 = vpack.c.bf16 %v1466_v29, %v1466_v29  ;;  %v1484_v41 = vpack.c.b16 %v326_v26, %v325_v23 }
  0x20   :  { %v1476_v35 = vadd.f32 %v152_v17, %v151_v30  ;;  %v381_v36 = vunpack.c.l.b16 %v122_v31  ;;  %v382_v37 = vunpack.c.l.b16 %v123_v32  ;;  %v121_v40 = vpack.c.bf16 %v1472_v33, %v1472_v33  ;;  %v205_v30 = vld [vmem:[%s1633_s3 + $0x8] sm:$0xf] }
  0x21   :  { %v409_v46 = vunpack.c.l.b16 %v124_v34  ;;  %v410_v47 = vunpack.c.l.b16 %v125_v38  ;;  %v353_v48 = vunpack.c.l.b16 %v120_v39  ;;  %v206_v39 = vld [vmem:[%s1633_s3 + $0xc] sm:$0xf] }
  0x22   :  { %v1486_v43 = vpack.c.b16 %v382_v37, %v381_v36  ;;  %v354_v49 = vunpack.c.l.b16 %v121_v40 }
  0x23   :  { %v1492_v50 = vpack.c.b16 %v410_v47, %v409_v46  ;;  %v1199_v47 = vld [vmem:[%s1634_s4] sm:$0xff] }
  0x24   :  { %v1494_v51 = vpack.c.b16 %v354_v49, %v353_v48 }
  0x28   :  { %1119 = vmatmul.msk.bf16.vlgmr.msrb.gmra.mxu0 %vm142_vm0, %v1484_v41 }
  0x2a   :  { %1129 = vmatmul.msk.bf16.vlgmr.msrb.gmra.mxu2 %vm142_vm0, %v1486_v43 }
  0x2c   :  { %1134 = vmatmul.msk.bf16.vlgmr.msrb.gmra.mxu3 %vm142_vm0, %v1492_v50 }
  0x2d   :  { %1124 = vmatmul.msk.bf16.vlgmr.msrb.gmra.mxu1 %vm142_vm0, %v1494_v51 }
  0x95   :  { %v234_v53 = vpop.f32.mrf.mxu0 }
  0x96   :  { %v435_v54 = vpack.c.bf16 %v234_v53, %v234_v53 }
  0x98   :  { %v453_v60 = vunpack.c.l.b16 %v435_v54  ;;  %v207_v54 = vld [vmem:[%s1633_s3 + $0x10] sm:$0xf] }
  0x9a   :  { %v262_v56 = vpop.f32.mrf.mxu1 }
  0x9b   :  { %v437_v63 = vpack.c.bf16 %v262_v56, %v262_v56  ;;  %v1203_v56 = vld [vmem:[%s1634_s4 + $0x20] sm:$0xff] }
  0x9d   :  { %v290_v57 = vpop.f32.mrf.mxu2  ;;  %v236_v58 = vpop.f32.mrf.mxu0  ;;  %v475_v5 = vunpack.c.l.b16 %v437_v63 }
  0x9e   :  { %v436_v61 = vpack.c.bf16 %v236_v58, %v236_v58  ;;  %v439_v2 = vpack.c.bf16 %v290_v57, %v290_v57 }
  0x9f   :  { %v318_v0 = vpop.f32.mrf.mxu3 }
  0xa0   :  { %v454_v62 = vunpack.c.l.b16 %v436_v61  ;;  %v497_v12 = vunpack.c.l.b16 %v439_v2  ;;  %v441_v13 = vpack.c.bf16 %v318_v0, %v318_v0  ;;  %v1200_v2 = vld [vmem:[%s1634_s4 + $0x8] sm:$0xff] }
  0xa2   :  { %v455_v1 = vpack.c.b16 %v454_v62, %v453_v60  ;;  %v264_v3 = vpop.f32.mrf.mxu1  ;;  %v519_v22 = vunpack.c.l.b16 %v441_v13  ;;  %v209_v13 = vld [vmem:[%s1633_s3 + $0x18] sm:$0xf] }
  0xa3   :  { %v438_v6 = vpack.c.bf16 %v264_v3, %v264_v3 }
  0xa4   :  { %467 = vmatpush.bf16.msra.mxu0 %v455_v1 }
  0xa5   :  { %v292_v7 = vpop.f32.mrf.mxu2  ;;  %v346_v8 = vpop.f32.mrf.mxu0  ;;  %v476_v11 = vunpack.c.l.b16 %v438_v6 }
  0xa6   :  { %v440_v10 = vpack.c.bf16 %v292_v7, %v292_v7  ;;  %v443_v20 = vpack.c.bf16 %v346_v8, %v346_v8  ;;  %v208_v8 = vld [vmem:[%s1633_s3 + $0x14] sm:$0xf] }
  0xa7   :  { %1135 = vmatmul.msk.bf16.vlgmr.msra.gmra.mxu0 %vm142_vm0, %v203_v4  ;;  %v477_v15 = vpack.c.b16 %v476_v11, %v475_v5  ;;  %v320_v16 = vpop.f32.mrf.mxu3  ;;  %v1201_v5 = vld [vmem:[%s1634_s4 + $0x10] sm:$0xff] }
  0xa8   :  { %v498_v14 = vunpack.c.l.b16 %v440_v10  ;;  %v442_v19 = vpack.c.bf16 %v320_v16, %v320_v16  ;;  %v541_v36 = vunpack.c.l.b16 %v443_v20  ;;  %v1204_v10 = vld [vmem:[%s1634_s4 + $0x28] sm:$0xff] }
  0xa9   :  { %489 = vmatpush.bf16.msra.mxu1 %v477_v15  ;;  %v1202_v15 = vld [vmem:[%s1634_s4 + $0x18] sm:$0xff] }
  0xaa   :  { %v499_v17 = vpack.c.b16 %v498_v14, %v497_v12  ;;  %v520_v23 = vunpack.c.l.b16 %v442_v19  ;;  %v374_v26 = vpop.f32.mrf.mxu1  ;;  %v1205_v14 = vld [vmem:[%s1634_s4 + $0x30] sm:$0xff]  ;;  %v1206_v19 = vld [vmem:[%s1634_s4 + $0x38] sm:$0xff] }
  0xab   :  { %v445_v40 = vpack.c.bf16 %v374_v26, %v374_v26 }
  0xac   :  { %511 = vmatpush.bf16.msra.mxu2 %v499_v17  ;;  %v521_v34 = vpack.c.b16 %v520_v23, %v519_v22  ;;  %1136 = vmatmul.msk.bf16.vlgmr.msra.gmra.mxu1 %vm142_vm0, %v204_v21  ;;  %v210_v17 = vld [vmem:[%s1633_s3 + $0x1c] sm:$0xf]  ;;  %v137_v23 = vmul.f32 %v1472_v33, %v1472_v33 }
  0xad   :  { %v402_v31 = vpop.f32.mrf.mxu2  ;;  %v348_v32 = vpop.f32.mrf.mxu0  ;;  %v563_v57 = vunpack.c.l.b16 %v445_v40 }
  0xae   :  { %v444_v37 = vpack.c.bf16 %v348_v32, %v348_v32  ;;  %533 = vmatpush.bf16.msra.mxu3 %v521_v34  ;;  %v447_v49 = vpack.c.bf16 %v402_v31, %v402_v31  ;;  %v139_v31 = vmul.f32 %v1458_v25, %v1458_v25  ;;  %v140_v34 = vmul.f32 %v1462_v27, %v1462_v27 }
  0xaf   :  { %1137 = vmatmul.msk.bf16.vlgmr.msra.gmra.mxu2 %vm142_vm0, %v205_v30  ;;  %v430_v46 = vpop.f32.mrf.mxu3 }
  0xb0   :  { %v542_v38 = vunpack.c.l.b16 %v444_v37  ;;  %v585_v63 = vunpack.c.l.b16 %v447_v49  ;;  %v449_v0 = vpack.c.bf16 %v430_v46, %v430_v46  ;;  %v168_v33 = vsel %vm142_vm0, %v139_v31, 0.0 }
  0xb1   :  { %1138 = vmatmul.msk.bf16.vlgmr.msra.gmra.mxu3 %vm142_vm0, %v206_v39  ;;  %v141_v37 = vmul.f32 %v1464_v28, %v1464_v28 }
  0xb2   :  { %v543_v48 = vpack.c.b16 %v542_v38, %v541_v36  ;;  %v376_v53 = vpop.f32.mrf.mxu1  ;;  %v607_v11 = vunpack.c.l.b16 %v449_v0 }
  0xb3   :  { %v446_v58 = vpack.c.bf16 %v376_v53, %v376_v53  ;;  %v172_v39 = vsel %vm142_vm0, %v141_v37, 0.0 }
  0xb4   :  { %555 = vmatpush.bf16.msrb.mxu0 %v543_v48 }
  0xb5   :  { %v404_v60 = vpop.f32.mrf.mxu2  ;;  %v564_v62 = vunpack.c.l.b16 %v446_v58 }
  0xb6   :  { %v448_v61 = vpack.c.bf16 %v404_v60, %v404_v60 }
  0xb7   :  { %1139 = vmatmul.msk.bf16.vlgmr.msrb.gmra.mxu0 %vm142_vm0, %v207_v54  ;;  %v565_v3 = vpack.c.b16 %v564_v62, %v563_v57  ;;  %v432_v4 = vpop.f32.mrf.mxu3 }
  0xb8   :  { %701 = vmatpush.bf16.msra.mxu0 %v1199_v47  ;;  %v586_v1 = vunpack.c.l.b16 %v448_v61  ;;  %v450_v7 = vpack.c.bf16 %v432_v4, %v432_v4 }
  0xb9   :  { %577 = vmatpush.bf16.msrb.mxu1 %v565_v3 }
  0xba   :  { %v587_v6 = vpack.c.b16 %v586_v1, %v585_v63  ;;  %v608_v12 = vunpack.c.l.b16 %v450_v7 }
  0xbc   :  { %781 = vmatpush.bf16.msrb.mxu0 %v1203_v56  ;;  %599 = vmatpush.bf16.msrb.mxu2 %v587_v6  ;;  %v609_v16 = vpack.c.b16 %v608_v12, %v607_v11 }
  0xbd   :  { %721 = vmatpush.bf16.msra.mxu1 %v1200_v2 }
  0xbe   :  { %1140 = vmatmul.msk.bf16.vlgmr.msrb.gmra.mxu1 %vm142_vm0, %v208_v8  ;;  %621 = vmatpush.bf16.msrb.mxu3 %v609_v16 }
  0xbf   :  { %1141 = vmatmul.msk.bf16.vlgmr.msrb.gmra.mxu2 %vm142_vm0, %v209_v13 }
  0xc0   :  { %741 = vmatpush.bf16.msra.mxu2 %v1201_v5 }
  0xc1   :  { %801 = vmatpush.bf16.msrb.mxu1 %v1204_v10  ;;  %1142 = vmatmul.msk.bf16.vlgmr.msrb.gmra.mxu3 %vm142_vm0, %v210_v17 }
  0xc2   :  { %761 = vmatpush.bf16.msra.mxu3 %v1202_v15 }
  0xc4   :  { %821 = vmatpush.bf16.msrb.mxu2 %v1205_v14 }
  0xc6   :  { %841 = vmatpush.bf16.msrb.mxu3 %v1206_v19 }
  0xc7   :  { %1147 = vmatmul.msk.bf16.vlgmr.msra.gmra.mxu0 %vm142_vm0, %v1401_v42  ;;  %v132_v42 = vmul.f32 %v1403_v44, %v1403_v44  ;;  %v136_v44 = vmul.f32 %v1466_v29, %v1466_v29 }
  0xce   :  { %1152 = vmatmul.msk.bf16.vlgmr.msra.gmra.mxu1 %vm142_vm0, %v1447_v18 }
  0xcf   :  { %1157 = vmatmul.msk.bf16.vlgmr.msra.gmra.mxu2 %vm142_vm0, %v1412_v52  ;;  %v133_v52 = vmul.f32 %v1405_v45, %v1405_v45 }
  0xd1   :  { %1162 = vmatmul.msk.bf16.vlgmr.msra.gmra.mxu3 %vm142_vm0, %v1437_v9  ;;  %v154_v9 = vsel %vm142_vm0, %v132_v42, 0.0  ;;  %v156_v18 = vsel %vm142_vm0, %v133_v52, 0.0 }
  0xd7   :  { %1167 = vmatmul.msk.bf16.vlgmr.msrb.gmra.mxu0 %vm142_vm0, %v1484_v41  ;;  %v134_v41 = vmul.f32 %v1418_v55, %v1418_v55  ;;  %v162_v55 = vsel %vm142_vm0, %v136_v44, 0.0 }
  0xde   :  { %1172 = vmatmul.msk.bf16.vlgmr.msrb.gmra.mxu1 %vm142_vm0, %v1494_v51  ;;  %v155_v51 = vadd.f32 %v154_v9, %v1476_v35  ;;  %v138_v35 = vmul.f32 %v1456_v24, %v1456_v24  ;;  %v170_v24 = vsel %vm142_vm0, %v140_v34, 0.0 }
  0xdf   :  { %1177 = vmatmul.msk.bf16.vlgmr.msrb.gmra.mxu2 %vm142_vm0, %v1486_v43  ;;  %v135_v43 = vmul.f32 %v1420_v59, %v1420_v59  ;;  %v164_v59 = vsel %vm142_vm0, %v137_v23, 0.0 }
  0xe0   :  { %v157_v20 = vadd.f32 %v156_v18, %v155_v51  ;;  %v166_v29 = vsel %vm142_vm0, %v138_v35, 0.0  ;;  %v680_v35 = vld [vmem:[#allocation5] sm:$0x3] }
  0xe1   :  { %1182 = vmatmul.msk.bf16.vlgmr.msrb.gmra.mxu3 %vm142_vm0, %v1492_v50  ;;  %v158_v50 = vsel %vm142_vm0, %v134_v41, 0.0  ;;  %v160_v45 = vsel %vm142_vm0, %v135_v43, 0.0 }
  0xe2   :  { %v159_v21 = vadd.f32 %v158_v50, %v157_v20 }
  0xe4   :  { %v161_v22 = vadd.f32 %v160_v45, %v159_v21 }
  0xe6   :  { %v163_v26 = vadd.f32 %v162_v55, %v161_v22 }
  0xe8   :  { %v165_v30 = vadd.f32 %v164_v59, %v163_v26 }
  0xea   :  { %v167_v32 = vadd.f32 %v166_v29, %v165_v30 }
  0xec   :  { %v169_v36 = vadd.f32 %v168_v33, %v167_v32 }
  0xee   :  { %v171_v38 = vadd.f32 %v170_v24, %v169_v36  ;;  %v681_v24 = vld [vmem:[#allocation5 + $0x2] sm:$0x3] }
  0xf0   :  { %v173_v46 = vadd.f32 %v172_v39, %v171_v38 }
  0xf2   :  { %174 = vadd.xlane.f32.xlu0 %v173_v46 }
 0x124   :  { %v469_v40 = vpop.f32.mrf.mxu0 }
 0x125   :  { %v627_v48 = vmul.f32 %v469_v40, %v469_v40 }
 0x127   :  { %v636_v27 = vsel %vm635_vm1, %v627_v48, 0.0 }
 0x129   :  { %v491_v25 = vpop.f32.mrf.mxu1 }
 0x12a   :  { %v628_v49 = vmul.f32 %v491_v25, %v491_v25 }
 0x12c   :  { %v471_v47 = vpop.f32.mrf.mxu0  ;;  %v637_v53 = vsel %vm635_vm1, %v628_v49, 0.0 }
 0x12d   :  { %v638_v57 = vadd.f32 %v637_v53, %v636_v27 }
 0x131   :  { %v493_v56 = vpop.f32.mrf.mxu1 }
 0x132   :  { %v513_v54 = vpop.f32.mrf.mxu2 }
 0x133   :  { %v629_v28 = vmul.f32 %v513_v54, %v513_v54 }
 0x134   :  { %v557_v58 = vpop.f32.mrf.mxu0  ;;  %v535_v61 = vpop.f32.mrf.mxu3 }
 0x135   :  { %v639_v60 = vsel %vm635_vm1, %v629_v28, 0.0  ;;  %v630_v62 = vmul.f32 %v535_v61, %v535_v61  ;;  %v631_v1 = vmul.f32 %v557_v58, %v557_v58  ;;  %v682_v61 = vld [vmem:[#allocation5 + $0x4] sm:$0x3] }
 0x136   :  { %v640_v63 = vadd.f32 %v639_v60, %v638_v57 }
 0x137   :  { %v641_v0 = vsel %vm635_vm1, %v630_v62, 0.0  ;;  %v643_v6 = vsel %vm635_vm1, %v631_v1, 0.0  ;;  %v684_v1 = vld [vmem:[#allocation5 + $0x8] sm:$0x3] }
 0x138   :  { %v642_v4 = vadd.f32 %v641_v0, %v640_v63 }
 0x13a   :  { %v515_v2 = vpop.f32.mrf.mxu2  ;;  %v644_v10 = vadd.f32 %v643_v6, %v642_v4  ;;  %v683_v4 = vld [vmem:[#allocation5 + $0x6] sm:$0x3] }
 0x13b   :  { %v579_v3 = vpop.f32.mrf.mxu1 }
 0x13c   :  { %v559_v5 = vpop.f32.mrf.mxu0  ;;  %v632_v7 = vmul.f32 %v579_v3, %v579_v3  ;;  %v537_v8 = vpop.f32.mrf.mxu3 }
 0x13e   :  { %v645_v11 = vsel %vm635_vm1, %v632_v7, 0.0 }
 0x13f   :  { %v646_v15 = vadd.f32 %v645_v11, %v644_v10  ;;  %v685_v11 = vld [vmem:[#allocation5 + $0xa] sm:$0x3] }
 0x142   :  { %v601_v12 = vpop.f32.mrf.mxu2 }
 0x143   :  { %v633_v13 = vmul.f32 %v601_v12, %v601_v12  ;;  %v581_v14 = vpop.f32.mrf.mxu1 }
 0x144   :  { %v703_v16 = vpop.f32.mrf.mxu0  ;;  %v623_v19 = vpop.f32.mrf.mxu3 }
 0x145   :  { %v647_v17 = vsel %vm635_vm1, %v633_v13, 0.0  ;;  %v634_v52 = vmul.f32 %v623_v19, %v623_v19  ;;  %v848_v18 = vpack.c.bf16 %v703_v16, %v703_v16 }
 0x146   :  { %v648_v42 = vadd.f32 %v647_v17, %v646_v15 }
 0x147   :  { %v649_v9 = vsel %vm635_vm1, %v634_v52, 0.0  ;;  %v866_v50 = vunpack.c.l.b16 %v848_v18 }
 0x148   :  { %v650_v51 = vadd.f32 %v649_v9, %v648_v42  ;;  %v686_v9 = vld [vmem:[#allocation5 + $0xc] sm:$0x3] }
 0x14a   :  { %v603_v41 = vpop.f32.mrf.mxu2  ;;  %651 = vadd.xlane.f32.xlu0 %v650_v51 }
 0x14b   :  { %v723_v43 = vpop.f32.mrf.mxu1  ;;  %v687_v41 = vld [vmem:[#allocation5 + $0xe] sm:$0x3] }
 0x14c   :  { %v705_v20 = vpop.f32.mrf.mxu0  ;;  %v625_v44 = vpop.f32.mrf.mxu3  ;;  %v850_v22 = vpack.c.bf16 %v723_v43, %v723_v43 }
 0x14d   :  { %v849_v21 = vpack.c.bf16 %v705_v20, %v705_v20 }
 0x14e   :  { %v888_v59 = vunpack.c.l.b16 %v850_v22 }
 0x14f   :  { %v867_v45 = vunpack.c.l.b16 %v849_v21 }
 0x151   :  { %v868_v23 = vpack.c.b16 %v867_v45, %v866_v50 }
 0x152   :  { %v743_v55 = vpop.f32.mrf.mxu2 }
 0x153   :  { %v725_v26 = vpop.f32.mrf.mxu1  ;;  %880 = vmatpush.bf16.msra.mxu0 %v868_v23  ;;  %v852_v34 = vpack.c.bf16 %v743_v55, %v743_v55 }
 0x154   :  { %v851_v30 = vpack.c.bf16 %v725_v26, %v725_v26  ;;  %v783_v31 = vpop.f32.mrf.mxu0  ;;  %v763_v29 = vpop.f32.mrf.mxu3 }
 0x155   :  { %v856_v36 = vpack.c.bf16 %v783_v31, %v783_v31  ;;  %v910_v40 = vunpack.c.l.b16 %v852_v34  ;;  %v854_v25 = vpack.c.bf16 %v763_v29, %v763_v29  ;;  %v1305_v29 = vmov 0.0  }
 0x156   :  { %v889_v32 = vunpack.c.l.b16 %v851_v30  ;;  %1183 = vmatmul.msk.bf16.vlgmr.msra.gmra.mxu0 %vm142_vm0, %v680_v35  ;;  %61 = vst [vmem:[#allocation7] sm:$0x7] %v1305_v29 }
 0x157   :  { %v954_v48 = vunpack.c.l.b16 %v856_v36  ;;  %v932_v57 = vunpack.c.l.b16 %v854_v25 }
 0x158   :  { %v890_v33 = vpack.c.b16 %v889_v32, %v888_v59 }
 0x15a   :  { %v745_v37 = vpop.f32.mrf.mxu2  ;;  %902 = vmatpush.bf16.msra.mxu1 %v890_v33 }
 0x15b   :  { %v853_v38 = vpack.c.bf16 %v745_v37, %v745_v37  ;;  %v803_v39 = vpop.f32.mrf.mxu1 }
 0x15c   :  { %v785_v46 = vpop.f32.mrf.mxu0  ;;  %v765_v27 = vpop.f32.mrf.mxu3  ;;  %v858_v28 = vpack.c.bf16 %v803_v39, %v803_v39 }
 0x15d   :  { %v911_v47 = vunpack.c.l.b16 %v853_v38  ;;  %v857_v49 = vpack.c.bf16 %v785_v46, %v785_v46  ;;  %1184 = vmatmul.msk.bf16.vlgmr.msra.gmra.mxu1 %vm142_vm0, %v681_v24  ;;  %v855_v54 = vpack.c.bf16 %v765_v27, %v765_v27  ;;  %v183_v36 = vld [vmem:[#allocation7] sm:$0x1] }
 0x15e   :  { %v976_v2 = vunpack.c.l.b16 %v858_v28 }
 0x15f   :  { %v912_v53 = vpack.c.b16 %v911_v47, %v910_v40  ;;  %v955_v56 = vunpack.c.l.b16 %v857_v49  ;;  %v933_v58 = vunpack.c.l.b16 %v855_v54 }
 0x161   :  { %924 = vmatpush.bf16.msra.mxu2 %v912_v53  ;;  %v956_v60 = vpack.c.b16 %v955_v56, %v954_v48  ;;  %v934_v63 = vpack.c.b16 %v933_v58, %v932_v57 }
 0x162   :  { %v823_v62 = vpop.f32.mrf.mxu2 }
 0x163   :  { %v805_v0 = vpop.f32.mrf.mxu1  ;;  %968 = vmatpush.bf16.msrb.mxu0 %v956_v60  ;;  %946 = vmatpush.bf16.msra.mxu3 %v934_v63  ;;  %v860_v8 = vpack.c.bf16 %v823_v62, %v823_v62 }
 0x164   :  { %1185 = vmatmul.msk.bf16.vlgmr.msra.gmra.mxu2 %vm142_vm0, %v682_v61  ;;  %v859_v3 = vpack.c.bf16 %v805_v0, %v805_v0  ;;  %v843_v5 = vpop.f32.mrf.mxu3 }
 0x165   :  { %v998_v13 = vunpack.c.l.b16 %v860_v8  ;;  %v862_v14 = vpack.c.bf16 %v843_v5, %v843_v5  ;;  %v175_v51 = vpop.xlane.xlu0 %174 }
 0x166   :  { %v977_v6 = vunpack.c.l.b16 %v859_v3  ;;  %1187 = vmatmul.msk.bf16.vlgmr.msrb.gmra.mxu0 %vm142_vm0, %v684_v1  ;;  %1186 = vmatmul.msk.bf16.vlgmr.msra.gmra.mxu3 %vm142_vm0, %v683_v4  ;;  %v176_v43 = vrot.slane %v175_v51, 4 }
 0x167   :  { %v1020_v42 = vunpack.c.l.b16 %v862_v14 }
 0x168   :  { %v978_v7 = vpack.c.b16 %v977_v6, %v976_v2  ;;  %v177_v20 = vadd.f32 %v176_v43, %v175_v51 }
 0x16a   :  { %v825_v10 = vpop.f32.mrf.mxu2  ;;  %990 = vmatpush.bf16.msrb.mxu1 %v978_v7  ;;  %v178_v50 = vrot.slane %v177_v20, 2 }
 0x16b   :  { %v861_v12 = vpack.c.bf16 %v825_v10, %v825_v10 }
 0x16c   :  { %v845_v16 = vpop.f32.mrf.mxu3  ;;  %v179_v21 = vadd.f32 %v178_v50, %v177_v20  ;;  %v1073_v50 = vld [vmem:[#allocation7 + $0x2] sm:$0x1] }
 0x16d   :  { %v999_v15 = vunpack.c.l.b16 %v861_v12  ;;  %1188 = vmatmul.msk.bf16.vlgmr.msrb.gmra.mxu1 %vm142_vm0, %v685_v11  ;;  %v863_v19 = vpack.c.bf16 %v845_v16, %v845_v16 }
 0x16e   :  { %v180_v44 = vrot.slane %v179_v21, 1 }
 0x16f   :  { %v1000_v17 = vpack.c.b16 %v999_v15, %v998_v13  ;;  %v1021_v52 = vunpack.c.l.b16 %v863_v19  ;;  %v660_v13 = vld [vmem:[#allocation7 + $0x1] sm:$0x1] }
 0x170   :  { %v181_v45 = vadd.f32 %v180_v44, %v179_v21 }
 0x171   :  { %1012 = vmatpush.bf16.msrb.mxu2 %v1000_v17  ;;  %v1022_v18 = vpack.c.b16 %v1021_v52, %v1020_v42 }
 0x172   :  { %1207 = vpush %v181_v45 }
 0x173   :  { %1034 = vmatpush.bf16.msrb.mxu3 %v1022_v18 }
 0x174   :  { %1189 = vmatmul.msk.bf16.vlgmr.msrb.gmra.mxu2 %vm142_vm0, %v686_v9 }
 0x176   :  { %1190 = vmatmul.msk.bf16.vlgmr.msrb.gmra.mxu3 %vm142_vm0, %v687_v41 }
 0x1a3   :  { %s1208_s3 = spop %1207 }
 0x1a4   :  { %v184_v33 = vstv %s1208_s3 }
 0x1a5   :  { %v185_v37 = vadd.f32 %v184_v33, %v183_v36 }
 0x1a7   :  { %186 = vst [vmem:[#allocation7] sm:$0x1] %v185_v37 }
 0x1bd   :  { %v652_v22 = vpop.xlane.xlu0 %651 }
 0x1be   :  { %v653_v23 = vrot.slane %v652_v22, 4 }
 0x1c0   :  { %v654_v55 = vadd.f32 %v653_v23, %v652_v22 }
 0x1c2   :  { %v655_v26 = vrot.slane %v654_v55, 2 }
 0x1c4   :  { %v656_v35 = vadd.f32 %v655_v26, %v654_v55 }
 0x1c6   :  { %v657_v59 = vrot.slane %v656_v35, 1 }
 0x1c8   :  { %v658_v30 = vadd.f32 %v657_v59, %v656_v35 }
 0x1ca   :  { %1209 = vpush %v658_v30 }
 0x1d3   :  { %v882_v31 = vpop.f32.mrf.mxu0 }
 0x1d4   :  { %v1040_v39 = vmul.f32 %v882_v31, %v882_v31 }
 0x1d6   :  { %v1049_v25 = vsel %vm1048_vm2, %v1040_v39, 0.0 }
 0x1da   :  { %v904_v32 = vpop.f32.mrf.mxu1 }
 0x1db   :  { %v884_v34 = vpop.f32.mrf.mxu0  ;;  %v1041_v40 = vmul.f32 %v904_v32, %v904_v32 }
 0x1dd   :  { %v1050_v47 = vsel %vm1048_vm2, %v1041_v40, 0.0 }
 0x1de   :  { %v1051_v53 = vadd.f32 %v1050_v47, %v1049_v25 }
 0x1e2   :  { %v906_v24 = vpop.f32.mrf.mxu1 }
 0x1e3   :  { %v970_v38 = vpop.f32.mrf.mxu0 }
 0x1e4   :  { %v1044_v60 = vmul.f32 %v970_v38, %v970_v38 }
 0x1e6   :  { %v1056_v63 = vsel %vm1048_vm2, %v1044_v60, 0.0 }
 0x1e7   :  { %v926_v46 = vpop.f32.mrf.mxu2 }
 0x1e8   :  { %v1042_v48 = vmul.f32 %v926_v46, %v926_v46 }
 0x1e9   :  { %v948_v54 = vpop.f32.mrf.mxu3 }
 0x1ea   :  { %v1052_v49 = vsel %vm1048_vm2, %v1042_v48, 0.0  ;;  %v992_v27 = vpop.f32.mrf.mxu1  ;;  %v1043_v28 = vmul.f32 %v948_v54, %v948_v54 }
 0x1eb   :  { %v972_v56 = vpop.f32.mrf.mxu0  ;;  %v1053_v57 = vadd.f32 %v1052_v49, %v1051_v53  ;;  %v1045_v0 = vmul.f32 %v992_v27, %v992_v27 }
 0x1ec   :  { %v1054_v58 = vsel %vm1048_vm2, %v1043_v28, 0.0 }
 0x1ed   :  { %v1055_v62 = vadd.f32 %v1054_v58, %v1053_v57  ;;  %v1058_v4 = vsel %vm1048_vm2, %v1045_v0, 0.0 }
 0x1ef   :  { %v928_v61 = vpop.f32.mrf.mxu2  ;;  %v1057_v3 = vadd.f32 %v1056_v63, %v1055_v62 }
 0x1f1   :  { %v950_v2 = vpop.f32.mrf.mxu3  ;;  %v1059_v7 = vadd.f32 %v1058_v4, %v1057_v3 }
 0x1f2   :  { %v994_v1 = vpop.f32.mrf.mxu1 }
 0x1f7   :  { %v1014_v5 = vpop.f32.mrf.mxu2 }
 0x1f8   :  { %v1046_v6 = vmul.f32 %v1014_v5, %v1014_v5 }
 0x1f9   :  { %v1036_v10 = vpop.f32.mrf.mxu3 }
 0x1fa   :  { %v1060_v8 = vsel %vm1048_vm2, %v1046_v6, 0.0  ;;  %v1047_v12 = vmul.f32 %v1036_v10, %v1036_v10 }
 0x1fb   :  { %v1061_v11 = vadd.f32 %v1060_v8, %v1059_v7  ;;  %s1210_s4 = spop %1209 }
 0x1fc   :  { %v661_v14 = vstv %s1210_s4  ;;  %v1062_v15 = vsel %vm1048_vm2, %v1047_v12, 0.0 }
 0x1fd   :  { %v662_v16 = vadd.f32 %v661_v14, %v660_v13  ;;  %v1063_v17 = vadd.f32 %v1062_v15, %v1061_v11 }
 0x1ff   :  { %v1016_v19 = vpop.f32.mrf.mxu2  ;;  %663 = vst [vmem:[#allocation7 + $0x1] sm:$0x1] %v662_v16  ;;  %1064 = vadd.xlane.f32.xlu1 %v1063_v17 }
 0x201   :  { %v1038_v42 = vpop.f32.mrf.mxu3 }
 0x272   :  { %v1065_v52 = vpop.xlane.xlu1 %1064 }
 0x273   :  { %v1066_v9 = vrot.slane %v1065_v52, 4 }
 0x275   :  { %v1067_v18 = vadd.f32 %v1066_v9, %v1065_v52 }
 0x277   :  { %v1068_v41 = vrot.slane %v1067_v18, 2 }
 0x279   :  { %v1069_v51 = vadd.f32 %v1068_v41, %v1067_v18 }
 0x27b   :  { %v1070_v43 = vrot.slane %v1069_v51, 1 }
 0x27d   :  { %v1071_v20 = vadd.f32 %v1070_v43, %v1069_v51 }
 0x27f   :  { %1211 = vpush %v1071_v20 }
 0x2b0   :  { %s1212_s5 = spop %1211 }
 0x2b1   :  { %v1074_v21 = vstv %s1212_s5 }
 0x2b2   :  { %v1075_v44 = vadd.f32 %v1074_v21, %v1073_v50 }
 0x2b4   :  { %1076 = vst [vmem:[#allocation7 + $0x2] sm:$0x1] %v1075_v44 }
 0x2b5   :  { %1087 = dma.vmem_to_hbm [thread:$0]  %s1083_s10, 64, %s1085_s12, [#allocation4]  }
 0x2b6   :  { %1297 = dma.done.wait [#allocation4], 64  }
 0x2b7   :  { %1298 = vsyncadd [#allocation4], 4294967232 }
 0x2b8   :  { %1092 = vsyncpa [#allocation3], 1 }
 0x2b9   :  { %1093 = vsyncpa [#allocation6], 1 }
 0x2ba   :  { %1094 = vsyncpa [#allocation4], 1 }

</bundles_post_ra>
